<compile_context>
chip_gen: v7x
topology: tpu7x:2x2x1
jax: 0.10.0
libtpu: 0.0.40
codegen_flags: <defaults>
</compile_context>

<pallas_src>
import functools

import jax
import jax.numpy as jnp
import numpy as np
from jax import lax
from jax.experimental import pallas as pl
from jax.experimental.pallas import tpu as pltpu

_INT32_MAX = 2147483647
_INT32_MIN = -2147483648
_SIGN_FLIP = 0x7FFFFFFF
_LANES = 128
_TILE = 8 * _LANES  # pad flattened frames to a multiple of (8, 128)


def _avg_floor(a, b):
    # Overflow-safe floor((a + b) / 2) for int32 (arithmetic shift).
    return (a & b) + ((a ^ b) >> 1)


def _scale_align_kernel(nval_ref, lo_ref, hi_ref, scale_ref, bvalid_ref,
                        ord_ref, num_ref, den_ref, *, num_passes):
    b = pl.program_id(0)

    x = ord_ref[...]                       # (rows, 128) int32, invalid = INT32_MAX
    n = nval_ref[b]                        # int32 scalar: number of valid pixels
    # torch.median returns sorted[(n-1)//2] -> 1-based rank kplus1
    kplus1 = ((n - 1) >> 1) + 1

    lo = jnp.full((1, 1), lo_ref[b], dtype=jnp.int32)
    hi = jnp.full((1, 1), hi_ref[b], dtype=jnp.int32)

    # 4-ary search: each pass shrinks [lo, hi] by >= 4x (r' <= floor(r/4)),
    # so 16 passes cover the full int32 key range.  Thresholds stay < INT32_MAX
    # while lo < hi, so the sentinel-padded invalid pixels are never counted.
    def body(_, carry):
        lo, hi = carry
        m2 = _avg_floor(lo, hi)
        m1 = _avg_floor(lo, m2)
        m3 = _avg_floor(m2, hi)
        c1 = jnp.sum((x <= m1).astype(jnp.int32), axis=(0, 1), keepdims=True)
        c2 = jnp.sum((x <= m2).astype(jnp.int32), axis=(0, 1), keepdims=True)
        c3 = jnp.sum((x <= m3).astype(jnp.int32), axis=(0, 1), keepdims=True)
        g1 = c1 >= kplus1
        g2 = c2 >= kplus1
        g3 = c3 >= kplus1
        new_lo = jnp.where(g1, lo,
                           jnp.where(g2, m1 + 1,
                                     jnp.where(g3, m2 + 1, m3 + 1)))
        new_hi = jnp.where(g1, m1,
                           jnp.where(g2, m2,
                                     jnp.where(g3, m3, hi)))
        return new_lo, new_hi

    lo, hi = lax.fori_loop(0, num_passes, body, (lo, hi))

    # Undo the order-preserving int32 mapping.
    med_bits = jnp.where(hi < 0, jnp.bitwise_xor(hi, _SIGN_FLIP), hi)
    median = pltpu.bitcast(med_bits, jnp.float32)            # (1, 1) f32

    # scale_tgt[b] = median(target[b][mask[b]]) if n > 10 else 0
    scale_tgt = jnp.where(n > 10, median, 0.0)               # (1, 1) f32

    valid = bvalid_ref[b] * (scale_tgt > 1e-8).astype(jnp.float32)   # (1, 1)
    diff = jnp.abs(scale_ref[b] - scale_tgt)                          # (1, 1)

    # Lane-dense per-batch partial outputs; final sum/divide happens in JAX.
    num_ref[...] = jnp.broadcast_to(diff * valid, (1, _LANES))
    den_ref[...] = jnp.broadcast_to(valid, (1, _LANES))


def scale_align_loss(prediction, target, mask, scale, dataset,
                     loss_weight=1.0, disable_dataset=("MapillaryPSD",)):
    B, C, H, W = prediction.shape
    N = C * H * W
    n_pad = (-N) % _TILE
    rows = (N + n_pad) // _LANES

    # Host-side: string membership has no device equivalent.
    batch_valid = jnp.asarray(
        [0.0 if d in disable_dataset else 1.0 for d in dataset], dtype=jnp.float32)

    tflat = target.reshape(B, N).astype(jnp.float32)
    mflat = mask.reshape(B, N).astype(bool)

    # Order-preserving int32 key of the float target values.
    bits = lax.bitcast_convert_type(tflat, jnp.int32)
    ordered = jnp.where(bits < 0, jnp.bitwise_xor(bits, _SIGN_FLIP), bits)

    n_valid = jnp.sum(mflat.astype(jnp.int32), axis=1)                # (B,) int32
    lo0 = jnp.min(jnp.where(mflat, ordered, _INT32_MAX), axis=1)      # (B,) int32
    hi0 = jnp.max(jnp.where(mflat, ordered, _INT32_MIN), axis=1)      # (B,) int32

    # Pre-mask (sentinel INT32_MAX), pad to lane-dense (rows, 128) tiles.
    ordered_masked = jnp.where(mflat, ordered, _INT32_MAX)
    if n_pad:
        ordered_masked = jnp.pad(ordered_masked, ((0, 0), (0, n_pad)),
                                 constant_values=_INT32_MAX)
    ordered_masked = ordered_masked.reshape(B, rows, _LANES)

    sc = scale.reshape(B).astype(jnp.float32)

    kernel = functools.partial(_scale_align_kernel, num_passes=16)

    num, den = pl.pallas_call(
        kernel,
        out_shape=(jax.ShapeDtypeStruct((B, 1, _LANES), jnp.float32),
                   jax.ShapeDtypeStruct((B, 1, _LANES), jnp.float32)),
        grid_spec=pltpu.PrefetchScalarGridSpec(
            num_scalar_prefetch=0,
            grid=(B,),
            in_specs=[
                pl.BlockSpec(memory_space=pltpu.MemorySpace.SMEM),   # n_valid (B,)
                pl.BlockSpec(memory_space=pltpu.MemorySpace.SMEM),   # lo0 (B,)
                pl.BlockSpec(memory_space=pltpu.MemorySpace.SMEM),   # hi0 (B,)
                pl.BlockSpec(memory_space=pltpu.MemorySpace.SMEM),   # scale (B,)
                pl.BlockSpec(memory_space=pltpu.MemorySpace.SMEM),   # batch_valid (B,)
                pl.BlockSpec((None, rows, _LANES), lambda b: (b, 0, 0)),
            ],
            out_specs=(pl.BlockSpec((None, 1, _LANES), lambda b: (b, 0, 0)),
                       pl.BlockSpec((None, 1, _LANES), lambda b: (b, 0, 0))),
        ),
        compiler_params=pltpu.CompilerParams(
            dimension_semantics=("parallel",),
            vmem_limit_bytes=48 * 1024 * 1024),
    )(n_valid, lo0, hi0, sc, batch_valid, ordered_masked)

    loss = jnp.sum(num[:, 0, 0]) / (jnp.sum(den[:, 0, 0]) + 1e-8)
    return loss * loss_weight


def _reference_loss(prediction, target, mask, scale, dataset,
                    loss_weight=1.0, disable_dataset=("MapillaryPSD",)):
    """Pure-JAX reference mirroring the PyTorch forward."""
    B = target.shape[0]
    bv = jnp.asarray(
        [0.0 if d in disable_dataset else 1.0 for d in dataset], dtype=jnp.float32)
    tflat = target.reshape(B, -1).astype(jnp.float32)
    mflat = mask.reshape(B, -1).astype(bool)
    n = jnp.sum(mflat.astype(jnp.int32), axis=1)
    keys = jnp.where(mflat, tflat, jnp.inf)
    srt = jnp.sort(keys, axis=1)
    k = jnp.maximum((n - 1) // 2, 0)
    med = jnp.take_along_axis(srt, k[:, None], axis=1)[:, 0]
    scale_tgt = jnp.where(n > 10, med, 0.0)
    valid = bv * (scale_tgt > 1e-8).astype(jnp.float32)
    diff = jnp.abs(scale.reshape(B).astype(jnp.float32) - scale_tgt)
    return jnp.sum(diff * valid) / (jnp.sum(valid) + 1e-8) * loss_weight


if __name__ == "__main__":
    key = jax.random.PRNGKey(0)
    k1, k2, k3, k4 = jax.random.split(key, 4)
    B, C, H, W = 2, 1, 16, 16

    prediction = jax.random.normal(k1, (B, C, H, W), dtype=jnp.float32)
    target = jax.random.uniform(k2, (B, C, H, W), dtype=jnp.float32,
                                minval=0.1, maxval=10.0)
    mask = jax.random.uniform(k3, (B, C, H, W), dtype=jnp.float32) > 0.4
    scale = jax.random.uniform(k4, (B, 1, 1, 1), dtype=jnp.float32,
                               minval=0.5, maxval=2.0)
    dataset = ("KITTI", "MapillaryPSD")   # second batch is disabled

    loss = scale_align_loss(prediction, target, mask, scale, dataset)
    loss = jax.block_until_ready(loss)

    ref = _reference_loss(prediction, target, mask, scale, dataset)
    np.testing.assert_allclose(np.asarray(loss), np.asarray(ref),
                               rtol=1e-6, atol=1e-6)
    print("KERNEL_OK")
</pallas_src>

<mosaic_0001>
module attributes {stable_mosaic.version = 11 : i64} {
  func.func @_scale_align_kernel(%arg0: i32, %arg1: memref<2xi32, #tpu.memory_space<smem>>, %arg2: memref<2xi32, #tpu.memory_space<smem>>, %arg3: memref<2xi32, #tpu.memory_space<smem>>, %arg4: memref<2xf32, #tpu.memory_space<smem>>, %arg5: memref<2xf32, #tpu.memory_space<smem>>, %arg6: memref<1x8x128xi32, #tpu.memory_space<vmem>>, %arg7: memref<1x1x128xf32, #tpu.memory_space<vmem>>, %arg8: memref<1x1x128xf32, #tpu.memory_space<vmem>>) attributes {dimension_semantics = [#tpu.dimension_semantics<parallel>], iteration_bounds = array<i64: 2>, scalar_prefetch = 0 : i64, scratch_operands = 0 : i64, tpu.core_type = #tpu.core_type<tc>, window_params = [{transform_indices = @transform_0, window_bounds = array<i64: 2>}, {transform_indices = @transform_1, window_bounds = array<i64: 2>}, {transform_indices = @transform_2, window_bounds = array<i64: 2>}, {transform_indices = @transform_3, window_bounds = array<i64: 2>}, {transform_indices = @transform_4, window_bounds = array<i64: 2>}, {transform_indices = @transform_5, window_bounds = array<i64: 1, 8, 128>}, {transform_indices = @transform_6, window_bounds = array<i64: 1, 1, 128>}, {transform_indices = @transform_7, window_bounds = array<i64: 1, 1, 128>}]} {
    %c0 = arith.constant 0 : index
    %c0_0 = arith.constant 0 : index
    %c0_1 = arith.constant 0 : index
    %0 = vector.load %arg6[%c0, %c0_0, %c0_1] : memref<1x8x128xi32, #tpu.memory_space<vmem>>, vector<1x8x128xi32>
    %1 = vector.shape_cast %0 : vector<1x8x128xi32> to vector<8x128xi32>
    %2 = arith.index_cast %arg0 : i32 to index
    %3 = memref.load %arg1[%2] : memref<2xi32, #tpu.memory_space<smem>>
    %c1_i32 = arith.constant 1 : i32
    %4 = arith.subi %3, %c1_i32 : i32
    %c1_i32_2 = arith.constant 1 : i32
    %5 = arith.shrsi %4, %c1_i32_2 : i32
    %c1_i32_3 = arith.constant 1 : i32
    %6 = arith.addi %5, %c1_i32_3 : i32
    %7 = arith.index_cast %arg0 : i32 to index
    %8 = memref.load %arg2[%7] : memref<2xi32, #tpu.memory_space<smem>>
    %9 = vector.broadcast %8 : i32 to vector<1x1xi32>
    %10 = arith.index_cast %arg0 : i32 to index
    %11 = memref.load %arg3[%10] : memref<2xi32, #tpu.memory_space<smem>>
    %12 = vector.broadcast %11 : i32 to vector<1x1xi32>
    %c0_i32 = arith.constant 0 : i32
    %c16_i32 = arith.constant 16 : i32
    %13 = arith.addi %c0_i32, %c16_i32 : i32
    %c1_i32_4 = arith.constant 1 : i32
    %14:2 = scf.for %arg9 = %c0_i32 to %13 step %c1_i32_4 iter_args(%arg10 = %9, %arg11 = %12) -> (vector<1x1xi32>, vector<1x1xi32>)  : i32 {
      %48 = arith.andi %arg10, %arg11 : vector<1x1xi32>
      %49 = arith.xori %arg10, %arg11 : vector<1x1xi32>
      %c1_i32_13 = arith.constant 1 : i32
      %50 = vector.broadcast %c1_i32_13 : i32 to vector<1x1xi32>
      %51 = arith.shrsi %49, %50 : vector<1x1xi32>
      %52 = arith.addi %48, %51 : vector<1x1xi32>
      %53 = arith.andi %arg10, %52 : vector<1x1xi32>
      %54 = arith.xori %arg10, %52 : vector<1x1xi32>
      %c1_i32_14 = arith.constant 1 : i32
      %55 = vector.broadcast %c1_i32_14 : i32 to vector<1x1xi32>
      %56 = arith.shrsi %54, %55 : vector<1x1xi32>
      %57 = arith.addi %53, %56 : vector<1x1xi32>
      %58 = arith.andi %52, %arg11 : vector<1x1xi32>
      %59 = arith.xori %52, %arg11 : vector<1x1xi32>
      %c1_i32_15 = arith.constant 1 : i32
      %60 = vector.broadcast %c1_i32_15 : i32 to vector<1x1xi32>
      %61 = arith.shrsi %59, %60 : vector<1x1xi32>
      %62 = arith.addi %58, %61 : vector<1x1xi32>
      %63 = vector.broadcast %57 : vector<1x1xi32> to vector<8x128xi32>
      %64 = arith.cmpi sle, %1, %63 : vector<8x128xi32>
      %65 = arith.extui %64 : vector<8x128xi1> to vector<8x128xi32>
      %66 = vector.shape_cast %65 : vector<8x128xi32> to vector<1x8x128xi32>
      %cst_16 = arith.constant dense<0> : vector<1xi32>
      %67 = vector.multi_reduction <add>, %66, %cst_16 [1, 2] : vector<1x8x128xi32> to vector<1xi32>
      %68 = vector.shape_cast %67 : vector<1xi32> to vector<1x1x1xi32>
      %69 = vector.extract %68[0, 0, 0] : i32 from vector<1x1x1xi32>
      %70 = vector.broadcast %69 : i32 to vector<1x1xi32>
      %71 = vector.broadcast %52 : vector<1x1xi32> to vector<8x128xi32>
      %72 = arith.cmpi sle, %1, %71 : vector<8x128xi32>
      %73 = arith.extui %72 : vector<8x128xi1> to vector<8x128xi32>
      %74 = vector.shape_cast %73 : vector<8x128xi32> to vector<1x8x128xi32>
      %cst_17 = arith.constant dense<0> : vector<1xi32>
      %75 = vector.multi_reduction <add>, %74, %cst_17 [1, 2] : vector<1x8x128xi32> to vector<1xi32>
      %76 = vector.shape_cast %75 : vector<1xi32> to vector<1x1x1xi32>
      %77 = vector.extract %76[0, 0, 0] : i32 from vector<1x1x1xi32>
      %78 = vector.broadcast %77 : i32 to vector<1x1xi32>
      %79 = vector.broadcast %62 : vector<1x1xi32> to vector<8x128xi32>
      %80 = arith.cmpi sle, %1, %79 : vector<8x128xi32>
      %81 = arith.extui %80 : vector<8x128xi1> to vector<8x128xi32>
      %82 = vector.shape_cast %81 : vector<8x128xi32> to vector<1x8x128xi32>
      %cst_18 = arith.constant dense<0> : vector<1xi32>
      %83 = vector.multi_reduction <add>, %82, %cst_18 [1, 2] : vector<1x8x128xi32> to vector<1xi32>
      %84 = vector.shape_cast %83 : vector<1xi32> to vector<1x1x1xi32>
      %85 = vector.extract %84[0, 0, 0] : i32 from vector<1x1x1xi32>
      %86 = vector.broadcast %85 : i32 to vector<1x1xi32>
      %87 = vector.broadcast %6 : i32 to vector<1x1xi32>
      %88 = arith.cmpi sge, %70, %87 : vector<1x1xi32>
      %89 = vector.broadcast %6 : i32 to vector<1x1xi32>
      %90 = arith.cmpi sge, %78, %89 : vector<1x1xi32>
      %91 = vector.broadcast %6 : i32 to vector<1x1xi32>
      %92 = arith.cmpi sge, %86, %91 : vector<1x1xi32>
      %c1_i32_19 = arith.constant 1 : i32
      %93 = vector.broadcast %c1_i32_19 : i32 to vector<1x1xi32>
      %94 = arith.addi %57, %93 : vector<1x1xi32>
      %c1_i32_20 = arith.constant 1 : i32
      %95 = vector.broadcast %c1_i32_20 : i32 to vector<1x1xi32>
      %96 = arith.addi %52, %95 : vector<1x1xi32>
      %c1_i32_21 = arith.constant 1 : i32
      %97 = vector.broadcast %c1_i32_21 : i32 to vector<1x1xi32>
      %98 = arith.addi %62, %97 : vector<1x1xi32>
      %99 = arith.select %92, %96, %98 : vector<1x1xi1>, vector<1x1xi32>
      %100 = arith.select %90, %94, %99 : vector<1x1xi1>, vector<1x1xi32>
      %101 = arith.select %88, %arg10, %100 : vector<1x1xi1>, vector<1x1xi32>
      %102 = arith.select %92, %62, %arg11 : vector<1x1xi1>, vector<1x1xi32>
      %103 = arith.select %90, %52, %102 : vector<1x1xi1>, vector<1x1xi32>
      %104 = arith.select %88, %57, %103 : vector<1x1xi1>, vector<1x1xi32>
      scf.yield %101, %104 : vector<1x1xi32>, vector<1x1xi32>
    }
    %c0_i32_5 = arith.constant 0 : i32
    %15 = vector.broadcast %c0_i32_5 : i32 to vector<1x1xi32>
    %16 = arith.cmpi slt, %14#1, %15 : vector<1x1xi32>
    %c2147483647_i32 = arith.constant 2147483647 : i32
    %17 = vector.broadcast %c2147483647_i32 : i32 to vector<1x1xi32>
    %18 = arith.xori %14#1, %17 : vector<1x1xi32>
    %19 = arith.select %16, %18, %14#1 : vector<1x1xi1>, vector<1x1xi32>
    %20 = tpu.bitcast %19 : vector<1x1xi32> -> vector<1x1xf32>
    %c10_i32 = arith.constant 10 : i32
    %21 = arith.cmpi sgt, %3, %c10_i32 : i32
    %cst = arith.constant 0.000000e+00 : f32
    %22 = vector.broadcast %cst : f32 to vector<1x1xf32>
    %23 = arith.select %21, %20, %22 : vector<1x1xf32>
    %24 = arith.index_cast %arg0 : i32 to index
    %25 = memref.load %arg5[%24] : memref<2xf32, #tpu.memory_space<smem>>
    %cst_6 = arith.constant 9.99999993E-9 : f32
    %26 = vector.broadcast %cst_6 : f32 to vector<1x1xf32>
    %27 = arith.cmpf ogt, %23, %26 : vector<1x1xf32>
    %28 = arith.extui %27 : vector<1x1xi1> to vector<1x1xi32>
    %29 = arith.sitofp %28 : vector<1x1xi32> to vector<1x1xf32>
    %30 = vector.broadcast %25 : f32 to vector<1x1xf32>
    %31 = arith.mulf %30, %29 : vector<1x1xf32>
    %32 = arith.index_cast %arg0 : i32 to index
    %33 = memref.load %arg4[%32] : memref<2xf32, #tpu.memory_space<smem>>
    %34 = vector.broadcast %33 : f32 to vector<1x1xf32>
    %35 = arith.subf %34, %23 : vector<1x1xf32>
    %36 = math.absf %35 : vector<1x1xf32>
    %37 = arith.mulf %36, %31 : vector<1x1xf32>
    %38 = vector.shape_cast %37 : vector<1x1xf32> to vector<1x1xf32>
    %39 = vector.broadcast %38 : vector<1x1xf32> to vector<1x128xf32>
    %c0_7 = arith.constant 0 : index
    %c0_8 = arith.constant 0 : index
    %c0_9 = arith.constant 0 : index
    %40 = vector.load %arg7[%c0_7, %c0_8, %c0_9] : memref<1x1x128xf32, #tpu.memory_space<vmem>>, vector<1x1x128xf32>
    %41 = vector.shape_cast %40 : vector<1x1x128xf32> to vector<1x128xf32>
    %42 = vector.shape_cast %39 : vector<1x128xf32> to vector<1x1x128xf32>
    tpu.vector_store %arg7[%c0_7, %c0_8, %c0_9], %42 {strides = array<i32>} : memref<1x1x128xf32, #tpu.memory_space<vmem>>, vector<1x1x128xf32>,
    %43 = vector.shape_cast %31 : vector<1x1xf32> to vector<1x1xf32>
    %44 = vector.broadcast %43 : vector<1x1xf32> to vector<1x128xf32>
    %c0_10 = arith.constant 0 : index
    %c0_11 = arith.constant 0 : index
    %c0_12 = arith.constant 0 : index
    %45 = vector.load %arg8[%c0_10, %c0_11, %c0_12] : memref<1x1x128xf32, #tpu.memory_space<vmem>>, vector<1x1x128xf32>
    %46 = vector.shape_cast %45 : vector<1x1x128xf32> to vector<1x128xf32>
    %47 = vector.shape_cast %44 : vector<1x128xf32> to vector<1x1x128xf32>
    tpu.vector_store %arg8[%c0_10, %c0_11, %c0_12], %47 {strides = array<i32>} : memref<1x1x128xf32, #tpu.memory_space<vmem>>, vector<1x1x128xf32>,
    return
  }
  func.func @transform_0(%arg0: i32) -> i32 {
    %c0_i32 = arith.constant 0 : i32
    %c0_i32_0 = arith.constant 0 : i32
    return %c0_i32 : i32
  }
  func.func @transform_1(%arg0: i32) -> i32 {
    %c0_i32 = arith.constant 0 : i32
    %c0_i32_0 = arith.constant 0 : i32
    return %c0_i32 : i32
  }
  func.func @transform_2(%arg0: i32) -> i32 {
    %c0_i32 = arith.constant 0 : i32
    %c0_i32_0 = arith.constant 0 : i32
    return %c0_i32 : i32
  }
  func.func @transform_3(%arg0: i32) -> i32 {
    %c0_i32 = arith.constant 0 : i32
    %c0_i32_0 = arith.constant 0 : i32
    return %c0_i32 : i32
  }
  func.func @transform_4(%arg0: i32) -> i32 {
    %c0_i32 = arith.constant 0 : i32
    %c0_i32_0 = arith.constant 0 : i32
    return %c0_i32 : i32
  }
  func.func @transform_5(%arg0: i32) -> (i32, i32, i32) {
    %c0_i32 = arith.constant 0 : i32
    %c0_i32_0 = arith.constant 0 : i32
    %c0_i32_1 = arith.constant 0 : i32
    return %arg0, %c0_i32, %c0_i32_0 : i32, i32, i32
  }
  func.func @transform_6(%arg0: i32) -> (i32, i32, i32) {
    %c0_i32 = arith.constant 0 : i32
    %c0_i32_0 = arith.constant 0 : i32
    %c0_i32_1 = arith.constant 0 : i32
    return %arg0, %c0_i32, %c0_i32_0 : i32, i32, i32
  }
  func.func @transform_7(%arg0: i32) -> (i32, i32, i32) {
    %c0_i32 = arith.constant 0 : i32
    %c0_i32_0 = arith.constant 0 : i32
    %c0_i32_1 = arith.constant 0 : i32
    return %arg0, %c0_i32, %c0_i32_0 : i32, i32, i32
  }
}

</mosaic_0001>

<bundles_post_ra>
// kernel: tpu_custom_call.1
= control target key start
LH: loop header
LB: loop body
LE: loop exit
PB: predicated region body
PF: predicated region fallthrough
CT: control target
= control target key end

     0   :  { %s1376_s0 = inlined_call_operand.hbm [shape: s32[2], index: 0, kind: input, shape index: {}]   ;;  %s1377_s1 = inlined_call_operand.vmem [shape: s32[2], index: 1, kind: input, shape index: {}]   ;;  %s1378_s2 = inlined_call_operand.vmem [shape: s32[2], index: 2, kind: input, shape index: {}]   ;;  %s1379_s3 = inlined_call_operand.hbm [shape: f32[2], index: 3, kind: input, shape index: {}]   ;;  %s1380_s4 = inlined_call_operand.hbm [shape: f32[2], index: 4, kind: input, shape index: {}]   ;;  %s1381_s5 = inlined_call_operand.vmem [shape: s32[2,8,128], index: 5, kind: input, shape index: {}]   ;;  %s1382_s6 = inlined_call_operand.hbm [shape: f32[2,1,128], index: 6, kind: output, shape index: {0}]   ;;  %s1383_s7 = inlined_call_operand.hbm [shape: f32[2,1,128], index: 7, kind: output, shape index: {1}]  }
   0x1   :  { %1385 = sst [smem:[#allocation21_spill]] %s1377_s1 }
   0x2   :  { %1386 = sst [smem:[#allocation22_spill]] %s1378_s2 }
   0x3   :  { %13 = vsyncpa [#allocation4], 0 }
   0x4   :  { %14 = vsyncpa [#allocation5], 0 }
   0x5   :  { %15 = vsyncpa [#allocation8], 0 }
   0x6   :  { %16 = vsyncpa [#allocation10], 0 }
   0x7   :  { %17 = vsyncpa [#allocation3], 0 }
   0x8   :  { %19 = vsyncpa [#allocation3 + $0x1], 0 }
   0x9   :  { %20 = vsyncpa [#allocation14], 0 }
   0xa   :  { %22 = vsyncpa [#allocation14 + $0x1], 0  ;;  %s1051_s24 = smov 0   ;;  %s1053_s25 = smov 0  }
   0xb   :  { %s1055_s26 = smov 0   ;;  %s1057_s27 = smov 0  }
   0xc LB: > { %s1072_s28 = sadd.s32 4294967295, %s988_s27   ;;  %s649_s29 = sadd.s32 4294967294, %s988_s27   ;;  %s988_s27 = sphi %s1057_s27, %s1407_s27   ;;  %s984_s26 = sphi %s1055_s26, %s1406_s26   ;;  %s980_s25 = sphi %s1053_s25, %s1405_s25   ;;  %s976_s24 = sphi %s1051_s24, %s1404_s24  }
   0xd   : > { %s1076_s30 = sadd.s32 1, %s988_s27   ;;  %s166_s8 = sadd.s32 1, %s984_s26 }
   0xe   : > { %s163_s9 = ssub.s32 %s988_s27, %s1076_s30  ;;  %p176_p0 = scmp.ne.s32.totalorder %s984_s26, %s980_s25 }
   0xf   : > { %p164_p1 = scmp.eq.s32.totalorder %s163_s9, 0  ;;  %p177_p2 = scmp.eq.s32.totalorder %s1072_s28, 1 }
  0x10   : > { %p182_p3 = scmp.ne.s32.totalorder %s980_s25, %s976_s24  ;;  %p183_p4 = scmp.eq.s32.totalorder %s649_s29, 1 }
  0x11   : > { %s1087_s10 = scalar_select %p164_p1, %s984_s26, %s166_s8  }
  0x12   : > { %p1089_p5 = por %p177_p2, %p176_p0  ;;  %p1093_p6 = por %p183_p4, %p182_p3 }
  0x13   : > { %p650_p7 = scmp.ge.s32.totalorder %s988_s27, 1  ;;  %p216_p8 = scmp.lt.s32.totalorder %s988_s27, 3 }
  0x14   : > { %s1388_s12 = scalar_select %p1093_p6, 1, 0 }
  0x15   : > { %p1099_p9 = pnand %p650_p7, %p216_p8  ;;  %p1384_p10 = scmp.eq.s32.totalorder %s1072_s28, 0 }
  0x16   : > { %s1390_s1 = sld [smem:[#allocation21_spill]]  ;;  %s1391_s2 = sld [smem:[#allocation22_spill]] }
  0x17   : > { %p700_p11 = pneg %p1099_p9  ;;  %s797_s23 = scalar_lea.hbm %s1379_s3, 16 }
  0x18   : > { %p798_p13 = scmp.ne.s32.totalorder %s1379_s3, %s797_s23  ;;  %p804_p3 = scmp.lt.u32.totalorder %s797_s23, %s1379_s3 }
  0x19   : > { %p1116_p12 = pnand %p1384_p10, %p700_p11 }
  0x1b   : > { %p1130_p0 = pneg %p1116_p12 }
  0x1c   : > { %s238_s16 = sshll.u32 %s1390_s1, 4  ;;  %s249_s19 = sshll.u32 %s1391_s2, 4  ;;  %s1109_s16 = int_to_ptr.vmem [resolvable:$true] %s238_s16  ;;  %s1120_s19 = int_to_ptr.vmem [resolvable:$true] %s249_s19 }
  0x1d   : > { %p800_p1 = pnand %p1130_p0, %p798_p13 }
  0x1f   : > { %p801_p2 = pneg %p800_p1 }
  0x21   : > { %p806_p4 = pnand %p804_p3, %p801_p2 }
  0x23   : > { %809 = shalt.err (!%p806_p4)
}
  0x24   : > { %s1002_s17 = smov [#allocation9]   ;;  %s810_s8 = scalar_lea.hbm %s1376_s0, 16 }
  0x25   : > { %712 = dma.hbm_to_smem (!%p1116_p12), %s1379_s3, 16, %s1002_s17, [#allocation10]  }
  0x26   : > { %p811_p7 = scmp.ne.s32.totalorder %s1376_s0, %s810_s8  ;;  %p817_p13 = scmp.lt.u32.totalorder %s810_s8, %s1376_s0 }
  0x28   : > { %p813_p8 = pnand %p811_p7, %p1130_p0 }
  0x2a   : > { %p814_p11 = pneg %p813_p8 }
  0x2c   : > { %p819_p1 = pnand %p817_p13, %p814_p11 }
  0x2e   : > { %822 = shalt.err (!%p819_p1)
}
  0x2f   : > { %s1003_s15 = smov [#allocation2]   ;;  %s823_s1 = scalar_lea.vmem %s1109_s16, 16 }
  0x30   : > { %703 = dma.hbm_to_smem (!%p1116_p12), %s1376_s0, 16, %s1003_s15, [#allocation4]  }
  0x31   : > { %p824_p2 = scmp.ne.s32.totalorder %s1109_s16, %s823_s1  ;;  %p831_p7 = scmp.lt.s32.totalorder %s1109_s16, %s1109_s16 }
  0x32   : > { %p832_p8 = scmp.lt.s32.totalorder %s823_s1, %s823_s1 }
  0x33   : > { %p826_p3 = pnand %p824_p2, %p1130_p0 }
  0x34   : > { %p833_p11 = por %p832_p8, %p831_p7 }
  0x35   : > { %p827_p4 = pneg %p826_p3 }
  0x37   : > { %p834_p13 = pnand %p833_p11, %p827_p4 }
  0x39   : > { %837 = shalt.err (!%p834_p13)
}
  0x3a   : > { %s1004_s2 = smov [#allocation6]   ;;  %s838_s21 = scalar_lea.vmem %s1120_s19, 16 }
  0x3b   : > { %706 = dma.vmem_to_smem (!%p1116_p12), %s1109_s16, 16, %s1004_s2, [#allocation5]  }
  0x3c   : > { %p839_p1 = scmp.ne.s32.totalorder %s1120_s19, %s838_s21  ;;  %p846_p10 = scmp.lt.s32.totalorder %s1120_s19, %s1120_s19 }
  0x3d   : > { %p847_p6 = scmp.lt.s32.totalorder %s838_s21, %s838_s21 }
  0x3e   : > { %p841_p2 = pnand %p839_p1, %p1130_p0 }
  0x3f   : > { %p848_p7 = por %p847_p6, %p846_p10 }
  0x40   : > { %p842_p3 = pneg %p841_p2 }
  0x42   : > { %p849_p4 = pnand %p848_p7, %p842_p3 }
  0x44   : > { %852 = shalt.err (!%p849_p4)
}
  0x45   : > { %s1005_s22 = smov [#allocation7]   ;;  %s853_s16 = scalar_lea.hbm %s1380_s4, 16 }
  0x46   : > { %709 = dma.vmem_to_smem (!%p1116_p12), %s1120_s19, 16, %s1005_s22, [#allocation8]  }
  0x47   : > { %p854_p8 = scmp.ne.s32.totalorder %s1380_s4, %s853_s16  ;;  %p860_p6 = scmp.lt.u32.totalorder %s853_s16, %s1380_s4 }
  0x49   : > { %p856_p11 = pnand %p854_p8, %p1130_p0 }
  0x4b   : > { %p857_p13 = pneg %p856_p11 }
  0x4d   : > { %p862_p10 = pnand %p860_p6, %p857_p13 }
  0x4f   : > { %865 = shalt.err (!%p862_p10)
}
  0x50   : > { %s1006_s18 = smov [#allocation11]   ;;  %287 = sbr.rel (%p1099_p9) target bundleno = 397 (0x18d), region = 44 }
  0x51   : > { %715 = dma.hbm_to_smem (!%p1116_p12), %s1380_s4, 16, %s1006_s18, [#allocation10]  }
  0x52   : > { %p1394_p1 = scmp.eq.s32.totalorder (!%p1099_p9), %s1072_s28, 0 }
  0x57   : > { %951 = dma.done.wait (%p1394_p1), [#allocation4], 16   ;;  %p1395_p0 = pmov %p1394_p1 }
  0x59   : > { %953 = vsyncadd (%p1395_p0), [#allocation4], 4294967280  ;;  %p1396_p2 = pmov %p1395_p0 }
  0x5a   : > { %p1397_p3 = pmov %p1395_p0 }
  0x5b   : > { %955 = dma.done.wait (%p1396_p2), [#allocation5], 16  }
  0x5c   : > { %957 = vsyncadd (%p1397_p3), [#allocation5], 4294967280  ;;  %p1398_p7 = pmov %p1395_p0 }
  0x5d   : > { %p1399_p12 = pmov %p1395_p0 }
  0x5e   : > { %959 = dma.done.wait (%p1398_p7), [#allocation8], 16  }
  0x5f   : > { %961 = vsyncadd (%p1399_p12), [#allocation8], 4294967280  ;;  %p1400_p9 = pmov %p1395_p0 }
  0x60   : > { %p1401_p4 = pmov %p1395_p0 }
  0x61   : > { %963 = dma.done.wait (%p1400_p9), [#allocation10], 32  }
  0x62   : > { %965 = vsyncadd (%p1401_p4), [#allocation10], 4294967264 }
  0x63   : > { %309 = sfence }
  0x64   : > { %s1213_s13 = sand.u32 1, %s980_s25   ;;  %p338_p8 = scmp.lt.s32.totalorder %s1072_s28, 1 }
  0x65   : > { %s1218_s9 = sld [smem:[#allocation2 + %s1072_s28]]  ;;  %s331_s17 = scalar_lea.vmem [#allocation12], %s1213_s13 }
  0x66   : > { %s339_s20 = scalar_select %p338_p8, %s1072_s28, 1 }
  0x67   : > { %s347_s2 = sld [smem:[#allocation6 + %s1072_s28]]  ;;  %s337_s18 = scalar_lea.vmem [#allocation13], %s1213_s13 }
  0x68   : > { %s663_s21 = sshll.u32 %s339_s20, 3  ;;  %s349_s22 = sld [smem:[#allocation7 + %s1072_s28]] }
  0x69   : > { %s341_s16 = scalar_lea.vmem %s1381_s5, %s663_s21  ;;  %s1237_s19 = smov 0  }
  0x6a   : > { %v1225_v0 = vld [vmem:[%s341_s16] sm:$0xff] }
  0x6b   : > { %s664_s23 = sadd.s32 4294967295, %s1218_s9 }
  0x6c   : > { %s1228_s14 = sshra.s32 %s664_s23, 1 }
  0x6d   : > { %v348_v1 = vstv %s347_s2   ;;  %s346_s15 = sadd.s32 1, %s1228_s14 }
  0x6e   : > { %v350_v2 = vstv %s349_s22  }
  0x6f LB: >> { %v359_v3 = vand.u32 %v992_v2, %v996_v1  ;;  %v360_v4 = vxor.u32 %v992_v2, %v996_v1  ;;  %v1007_v9 = vmov 0   ;;  %s356_s19 = sadd.s32 1, %s1000_s19   ;;  %s1000_s19 = sphi %s1237_s19, %s356_s19   ;;  %v996_v1 = vphi %v348_v1, %v446_v1   ;;  %v992_v2 = vphi %v350_v2, %v1402_v2  }
  0x70   : >> { %p353_p11 = scmp.ge.s32.totalorder %s356_s19, 16  }
  0x71   : >> { %v361_v5 = vshra.s32 %v360_v4, 1  ;;  %p454_p13 = scmp.gt.s32.totalorder (%p353_p11), %s1218_s9, 10  ;;  %s459_s21 = sld [smem:[#allocation11 + %s1072_s28]] (%p353_p11) }
  0x72   : > { %s465_s22 = sld [smem:[#allocation9 + %s1072_s28]] (%p353_p11)  ;;  %s666_s8 = sshll.u32 (%p353_p11), %s1072_s28, 4 }
  0x73   : >> { %v1252_v6 = vadd.s32 %v361_v5, %v359_v3  ;;  %s502_s16 = sshll.u32 (%p353_p11), %s337_s18, 4  ;;  %s489_s9 = sshll.u32 (%p353_p11), %s331_s17, 4  ;;  %s1302_s16 = int_to_ptr.vmem [resolvable:$true] %s502_s16  ;;  %s1311_s9 = int_to_ptr.vmem [resolvable:$true] %s489_s9 }
  0x75   : >> { %vm393_vm0 = vcmp.le.s32.totalorder %v1225_v0, %v1252_v6  ;;  %v367_v7 = vand.u32 %v992_v2, %v1252_v6  ;;  %v368_v8 = vxor.u32 %v992_v2, %v1252_v6  ;;  %v363_v11 = vand.u32 %v996_v1, %v1252_v6 }
  0x76   : >> { %v394_v10 = vsel %vm393_vm0, 1, %v1007_v9  ;;  %v364_v12 = vxor.u32 %v996_v1, %v1252_v6 }
  0x77   : >> { %v396_v13 = vshrl.u32 %v394_v10, 16  ;;  %v369_v14 = vshra.s32 %v368_v8, 1  ;;  %v395_v23 = vand.u32 65535, %v394_v10 }
  0x78   : >> { %v365_v15 = vshra.s32 %v364_v12, 1 }
  0x79   : >> { %v398_v16 = vcvt.s32.f32 %v396_v13  ;;  %v1264_v17 = vadd.s32 %v369_v14, %v367_v7  ;;  %v397_v29 = vcvt.s32.f32 %v395_v23  ;;  %v442_v7 = vadd.s32 1, %v1252_v6 }
  0x7a   : >> { %v1266_v18 = vadd.s32 %v365_v15, %v363_v11 }
  0x7b   : >> { %401 = vadd.xlane.f32.xlu0 %v398_v16  ;;  %vm415_vm1 = vcmp.le.s32.totalorder %v1225_v0, %v1264_v17  ;;  %v443_v8 = vadd.s32 1, %v1264_v17 }
  0x7c   : >> { %v416_v19 = vsel %vm415_vm1, 1, %v1007_v9  ;;  %vm371_vm2 = vcmp.le.s32.totalorder %v1225_v0, %v1266_v18  ;;  %v441_v11 = vadd.s32 1, %v1266_v18  ;;  %v466_v0 = vstv (%p353_p11), %s465_s22 }
  0x7d   : >> { %v418_v20 = vshrl.u32 %v416_v19, 16  ;;  %v372_v21 = vsel %vm371_vm2, 1, %v1007_v9  ;;  %v417_v28 = vand.u32 65535, %v416_v19  ;;  %v437_v9 = vstv %s346_s15  ;;  %s1300_s15 = scalar_lea.hbm (%p353_p11), %s1383_s7, %s666_s8 }
  0x7e   : >> { %v374_v22 = vshrl.u32 %v372_v21, 16  ;;  %v373_v24 = vand.u32 65535, %v372_v21  ;;  %v463_v21 = vstv (%p353_p11), %s459_s21  ;;  %s1009_s21 = smov (%p353_p11), [#allocation13]  }
  0x7f   : >> { %v420_v25 = vcvt.s32.f32 %v418_v20  ;;  %v419_v30 = vcvt.s32.f32 %v417_v28  ;;  %s870_s22 = sshll.u32 (%p353_p11), %s1009_s21, 4  ;;  %s871_s22 = int_to_ptr.vmem [resolvable:$false] %s870_s22 }
  0x80   : >> { %v376_v26 = vcvt.s32.f32 %v374_v22  ;;  %v375_v27 = vcvt.s32.f32 %v373_v24  ;;  %p873_p0 = scmp.lt.s32.totalorder (%p353_p11), %s1302_s16, %s871_s22 }
  0x81   : >> { %423 = vadd.xlane.f32.xlu1 %v420_v25 }
  0x82   : >> { %379 = vadd.xlane.f32.xlu0 %v376_v26 }
  0x85   : >> { %377 = vadd.xlane.f32.xlu1 %v375_v27 }
  0x86   : >> { %399 = vadd.xlane.f32.xlu0 %v397_v29 }
  0x89   : >> { %421 = vadd.xlane.f32.xlu1 %v419_v30 }
 0x108   : >> { %v402_v31 = vpop.xlane.xlu0 %401 }
 0x109   : >> { %v404_v34 = vcvt.f32.s32 %v402_v31 }
 0x10b   : >> { %v405_v41 = vshll.u32 %v404_v34, 16 }
 0x10e   : >> { %v424_v32 = vpop.xlane.xlu1 %423 }
 0x10f   : >> { %v380_v33 = vpop.xlane.xlu0 %379  ;;  %v426_v38 = vcvt.f32.s32 %v424_v32 }
 0x110   : >> { %v382_v35 = vcvt.f32.s32 %v380_v33 }
 0x111   : >> { %v427_v46 = vshll.u32 %v426_v38, 16 }
 0x112   : >> { %v383_v36 = vshll.u32 %v382_v35, 16  ;;  %v378_v37 = vpop.xlane.xlu1 %377 }
 0x113   : >> { %v400_v39 = vpop.xlane.xlu0 %399  ;;  %v381_v40 = vcvt.f32.s32 %v378_v37 }
 0x114   : >> { %v403_v42 = vcvt.f32.s32 %v400_v39 }
 0x115   : >> { %v384_v43 = vadd.s32 %v383_v36, %v381_v40 }
 0x116   : >> { %v406_v44 = vadd.s32 %v405_v41, %v403_v42  ;;  %v422_v45 = vpop.xlane.xlu1 %421 }
 0x117   : >> { %v385_v47 = vrot.slane %v384_v43, 4  ;;  %v425_v48 = vcvt.f32.s32 %v422_v45 }
 0x118   : >> { %v407_v49 = vrot.slane %v406_v44, 4 }
 0x119   : >> { %v428_v50 = vadd.s32 %v427_v46, %v425_v48  ;;  %v386_v51 = vadd.s32 %v385_v47, %v384_v43 }
 0x11a   : >> { %v408_v52 = vadd.s32 %v407_v49, %v406_v44 }
 0x11b   : >> { %v429_v53 = vrot.slane %v428_v50, 4  ;;  %v387_v54 = vrot.slane %v386_v51, 2 }
 0x11c   : >> { %v409_v55 = vrot.slane %v408_v52, 2 }
 0x11d   : >> { %v430_v56 = vadd.s32 %v429_v53, %v428_v50  ;;  %v388_v57 = vadd.s32 %v387_v54, %v386_v51 }
 0x11e   : >> { %v410_v58 = vadd.s32 %v409_v55, %v408_v52 }
 0x11f   : >> { %v389_v59 = vrot.slane %v388_v57, 1  ;;  %v431_v60 = vrot.slane %v430_v56, 2 }
 0x120   : >> { %v411_v61 = vrot.slane %v410_v58, 1 }
 0x121   : >> { %v390_v62 = vadd.s32 %v389_v59, %v388_v57  ;;  %v432_v63 = vadd.s32 %v431_v60, %v430_v56 }
 0x122   : >> { %v412_v3 = vadd.s32 %v411_v61, %v410_v58 }
 0x123   : >> { %670 = vpush %v390_v62  ;;  %v433_v4 = vrot.slane %v432_v63, 1 }
 0x124   : >> { %672 = vpush %v412_v3 }
 0x125   : >> { %v434_v5 = vadd.s32 %v433_v4, %v432_v63 }
 0x127   : >> { %674 = vpush %v434_v5 }
 0x154   : >> { %s671_s1 = spop %670 }
 0x155   : >> { %s673_s20 = spop %672  ;;  %v392_v12 = vstv %s671_s1  ;;  %s1309_s1 = scalar_lea.hbm (%p353_p11), %s1382_s6, %s666_s8 }
 0x156   : >> { %v414_v10 = vstv %s673_s20  ;;  %vm438_vm5 = vcmp.ge.s32.totalorder %v392_v12, %v437_v9  ;;  %s477_s20 = scalar_lea.sflag (%p353_p11), [#allocation14], %s1213_s13 }
 0x157   : >> { %vm439_vm4 = vcmp.ge.s32.totalorder %v414_v10, %v437_v9 }
 0x158   : >> { %s675_s2 = spop %674  ;;  %355 = sbr.rel (!%p353_p11) target bundleno = 111 (0x6f), region = 125 }
 0x159   : >> { %v436_v13 = vstv %s675_s2  ;;  %s866_s2 = scalar_lea.vmem (%p353_p11), %s1302_s16, 16 }
 0x15a   : >> { %vm440_vm3 = vcmp.ge.s32.totalorder %v436_v13, %v437_v9  ;;  %p867_p6 = scmp.ne.s32.totalorder (%p353_p11), %s1302_s16, %s866_s2 }
 0x15b   : >> { %v444_v14 = vsel %vm440_vm3, %v442_v7, %v443_v8  ;;  %v447_v15 = vsel %vm440_vm3, %v1264_v17, %v992_v2 }
 0x15c   : >> { %v445_v16 = vsel %vm439_vm4, %v441_v11, %v444_v14  ;;  %v448_v19 = vsel %vm439_vm4, %v1252_v6, %v447_v15  ;;  %p868_p10 = pnand (%p353_p11), %p867_p6, %p1089_p5 }
 0x15d   : >> { %v446_v1 = vsel %vm438_vm5, %v996_v1, %v445_v16   ;;  %v449_v20 = vsel %vm438_vm5, %v1266_v18, %v448_v19  }
 0x15e   : >> { %v1402_v2 = vmov %v449_v20  ;;  %vm450_vm6 = vcmp.lt.s32.totalorder (%p353_p11), %v449_v20, 0  ;;  %v451_v6 = vxor.u32 (%p353_p11), 2147483647, %v449_v20  ;;  %p869_p1 = pneg (%p353_p11), %p868_p10 }
 0x15f   : > { %s455_s29 = scalar_select %p454_p13, 1, 0  ;;  %v1008_v2 = vmov 0.0  }
 0x160   : > { %v452_v17 = vsel %vm450_vm6, %v451_v6, %v449_v20 }
 0x161   : > { %v456_v18 = vstv %s455_s29  ;;  %s872_s29 = scalar_lea.vmem %s871_s22, 32 }
 0x162   : > { %vm457_vm7 = vcmp.eq.s32.totalorder %v456_v18, 1  ;;  %p874_p2 = scmp.lt.s32.totalorder %s872_s29, %s866_s2 }
 0x163   : > { %v458_v1 = vsel %vm457_vm7, %v452_v17, 0.0 }
 0x164   : > { %vm460_vm8 = vcmp.gt.f32.partialorder %v458_v1, 1e-08  ;;  %v467_v23 = vsub.f32 %v466_v0, %v458_v1  ;;  %p875_p3 = por %p874_p2, %p873_p0 }
 0x165   : > { %v665_v22 = vsel %vm460_vm8, 1.0, %v1008_v2 }
 0x166   : > { %v464_v24 = vmul.f32 %v665_v22, %v463_v21  ;;  %v468_v25 = vand.u32 2147483647, %v467_v23  ;;  %p876_p7 = pnand %p875_p3, %p869_p1 }
 0x168   : > { %471 = vst [vmem:[%s337_s18] sm:$0x1] %v464_v24  ;;  %v469_v26 = vmul.f32 %v468_v25, %v464_v24 }
 0x169   : > { %879 = shalt.err (!%p876_p7)
}
 0x16a   : > { %s880_s18 = scalar_lea.hbm %s1300_s15, 16  ;;  %s884_s14 = scalar_lea.hbm %s1383_s7, 32 }
 0x16b   : > { %p881_p12 = scmp.ne.s32.totalorder %s1300_s15, %s880_s18  ;;  %p885_p8 = scmp.lt.u32.totalorder %s1300_s15, %s1383_s7 }
 0x16c   : > { %p886_p11 = scmp.lt.u32.totalorder %s884_s14, %s880_s18  ;;  %p888_p6 = scmp.lt.u32.totalorder %s880_s18, %s1300_s15 }
 0x16d   : > { %p882_p9 = pnand %p881_p12, %p1089_p5 }
 0x16e   : > { %p887_p13 = por %p886_p11, %p885_p8 }
 0x16f   : > { %p883_p4 = pneg %p882_p9 }
 0x170   : > { %p889_p10 = por %p888_p6, %p887_p13 }
 0x172   : > { %p890_p1 = pnand %p889_p10, %p883_p4 }
 0x174   : > { %893 = shalt.err (!%p890_p1)
}
 0x175   : > { %697 = dma.vmem_to_hbm [thread:$0]  (%p1089_p5), %s1302_s16, 16, %s1300_s15, %s477_s20   ;;  %470 = vst [vmem:[%s331_s17] sm:$0x1] %v469_v26 }
 0x176   : > { %s473_s2 = scalar_lea.sflag [#allocation3], %s1213_s13  ;;  %s894_s21 = scalar_lea.vmem %s1311_s9, 16 }
 0x177   : > { %p895_p0 = scmp.ne.s32.totalorder %s1311_s9, %s894_s21  ;;  %s1010_s22 = smov [#allocation12]  }
 0x178   : > { %s898_s29 = sshll.u32 %s1010_s22, 4  ;;  %s899_s29 = int_to_ptr.vmem [resolvable:$false] %s898_s29 }
 0x179   : > { %p896_p2 = pnand %p895_p0, %p1089_p5  ;;  %s900_s18 = scalar_lea.vmem %s899_s29, 32 }
 0x17a   : > { %p901_p7 = scmp.lt.s32.totalorder %s1311_s9, %s899_s29  ;;  %p902_p12 = scmp.lt.s32.totalorder %s900_s18, %s894_s21 }
 0x17b   : > { %p897_p3 = pneg %p896_p2 }
 0x17c   : > { %p903_p9 = por %p902_p12, %p901_p7 }
 0x17e   : > { %p904_p4 = pnand %p903_p9, %p897_p3 }
 0x180   : > { %907 = shalt.err (!%p904_p4)
}
 0x181   : > { %s908_s13 = scalar_lea.hbm %s1309_s1, 16  ;;  %s912_s15 = scalar_lea.hbm %s1382_s6, 32 }
 0x182   : > { %p909_p8 = scmp.ne.s32.totalorder %s1309_s1, %s908_s13  ;;  %p913_p6 = scmp.lt.u32.totalorder %s1309_s1, %s1382_s6 }
 0x183   : > { %p914_p10 = scmp.lt.u32.totalorder %s912_s15, %s908_s13  ;;  %p916_p0 = scmp.lt.u32.totalorder %s908_s13, %s1309_s1 }
 0x184   : > { %p910_p11 = pnand %p909_p8, %p1089_p5 }
 0x185   : > { %p915_p1 = por %p914_p10, %p913_p6 }
 0x186   : > { %p911_p13 = pneg %p910_p11 }
 0x187   : > { %p917_p2 = por %p916_p0, %p915_p1 }
 0x189   : > { %p918_p3 = pnand %p917_p2, %p911_p13 }
 0x18b   : > { %921 = shalt.err (!%p918_p3)
}
 0x18c   : > { %696 = dma.vmem_to_hbm [thread:$0]  (%p1089_p5), %s1311_s9, 16, %s1309_s1, %s473_s2  }
 0x18d PF: > { %p733_p7 = scmp.ge.s32.totalorder %s988_s27, 2  ;;  %s514_s23 = sand.u32 1, %s976_s24  }
 0x18e   : > { %p1403_p12 = scmp.ne.s32.totalorder %s1388_s12, 0  ;;  %s515_s14 = scalar_lea.sflag [#allocation3], %s514_s23 }
 0x190   : > { %p717_p9 = pnand %p733_p7, %p1403_p12 }
 0x192   : > { %967 = dma.done.wait (!%p717_p9), %s515_s14, 16  }
 0x193   : > { %969 = vsyncadd (!%p717_p9), %s515_s14, 4294967280  ;;  %s523_s28 = scalar_lea.sflag [#allocation14], %s514_s23 }
 0x194   : > { %971 = dma.done.wait (!%p717_p9), %s523_s28, 16  }
 0x195   : > { %973 = vsyncadd (!%p717_p9), %s523_s28, 4294967280  ;;  %p25_p5 = scmp.ge.s32.totalorder %s1076_s30, 4   ;;  %s1404_s24 = smov %s980_s25 }
 0x196   : > { %s1405_s25 = smov %s984_s26  ;;  %s1406_s26 = smov %s1087_s10 }
 0x197   : > { %s1407_s27 = smov %s1076_s30  ;;  %27 = sbr.rel (!%p25_p5) target bundleno = 12 (0xc), region = 136 }
 0x19e   :  { %527 = vsyncpa [#allocation3], 1 }
 0x19f   :  { %529 = vsyncpa [#allocation3 + $0x1], 1 }
 0x1a0   :  { %530 = vsyncpa [#allocation14], 1 }
 0x1a1   :  { %532 = vsyncpa [#allocation14 + $0x1], 1 }
 0x1a2   :  { %533 = vsyncpa [#allocation4], 1 }
 0x1a3   :  { %535 = vsyncpa [#allocation4 + $0x1], 1 }
 0x1a4   :  { %536 = vsyncpa [#allocation10], 1 }
 0x1a5   :  { %537 = vsyncpa [#allocation5], 1 }
 0x1a6   :  { %539 = vsyncpa [#allocation5 + $0x1], 1 }
 0x1a7   :  { %540 = vsyncpa [#allocation8], 1 }

</bundles_post_ra>
